<compile_context>
chip_gen: v5e
topology: v5e:2x2
jax: 0.10.0
libtpu: 0.0.40
codegen_flags: <defaults>
</compile_context>

<pallas_src>
import jax
import jax.numpy as jnp
from jax.experimental import pallas as pl
from jax.experimental.pallas import tpu as pltpu


def nplm_kernel(x_ref, w1_ref, b1_ref, w2_ref, w3_ref, b3_ref, z_ref, h_ref):
    # Grid: (num_V_tiles, num_B_tiles); V outer ("arbitrary"), B inner ("parallel").
    # x_ref : (tm, D_in)    bf16  batch tile of concatenated context embeddings
    # w1_ref: (D_in, Hp)    bf16  fully resident
    # b1_ref: (1, Hp)       f32
    # w2_ref: (Hp, tn)      bf16  vocab tile, resident across the inner batch loop
    # w3_ref: (D_in, tn)    bf16  vocab tile, resident across the inner batch loop
    # b3_ref: (1, tn)       f32
    # z_ref : (tm, tn)      f32   logits tile
    # h_ref : (nB, tm, Hp)  bf16  cached hidden activations, one slab per batch tile
    v = pl.program_id(0)
    b = pl.program_id(1)

    # Hidden layer: compute once per batch tile (first vocab pass), reuse afterwards.
    @pl.when(v == 0)
    def _():
        pre = (
            jnp.dot(x_ref[...], w1_ref[...], preferred_element_type=jnp.float32)
            + b1_ref[...]
        )
        h_ref[b] = jnp.tanh(pre).astype(h_ref.dtype)

    h = h_ref[b]
    z = (
        jnp.dot(x_ref[...], w3_ref[...], preferred_element_type=jnp.float32)
        + jnp.dot(h, w2_ref[...], preferred_element_type=jnp.float32)
        + b3_ref[...]
    )
    z_ref[...] = z.astype(z_ref.dtype)


def _round_up(x, m):
    return (x + m - 1) // m * m


def nplm_forward(tokens, emb_table, w1, b1, w2, w3, b3, *, tm=128, tn=None):
    """tokens: [B, n-1] int32. Weights stored [in_dim, out_dim]. Returns f32 [B, vocab]."""
    B, ctx = tokens.shape
    vec_dim = emb_table.shape[1]
    d_in = ctx * vec_dim
    H = w1.shape[1]
    V = w2.shape[1]

    # Glue: embedding lookup + flatten (== emb(x).view(len(x), -1)).
    e = jnp.take(emb_table, tokens, axis=0).reshape(B, d_in)

    # Lane / MXU friendly padded shapes.
    if tn is None:
        tn = min(256, _round_up(V, 128))
    Vp = _round_up(V, tn)
    Hp = _round_up(H, 128)
    Bp = _round_up(B, tm)
    nB = Bp // tm
    nV = Vp // tn

    wdt = jnp.bfloat16  # MXU-native streaming dtype; accumulation stays f32.
    e_p = jnp.pad(e.astype(wdt), ((0, Bp - B), (0, 0)))
    w1_p = jnp.pad(w1.astype(wdt), ((0, 0), (0, Hp - H)))
    b1_p = jnp.pad(b1.astype(jnp.float32), ((0, 0), (0, Hp - H)))
    w2_p = jnp.pad(w2.astype(wdt), ((0, Hp - H), (0, Vp - V)))
    w3_p = jnp.pad(w3.astype(wdt), ((0, 0), (0, Vp - V)))
    b3_p = jnp.pad(b3.astype(jnp.float32), ((0, 0), (0, Vp - V)))

    cost = pl.CostEstimate(
        flops=2 * Bp * d_in * Hp + 2 * Bp * (d_in + Hp) * Vp,
        transcendentals=Bp * Hp,
        bytes_accessed=(
            e_p.size * 2 * nV          # x tile re-streamed once per vocab tile
            + (w1_p.size + w2_p.size + w3_p.size) * 2
            + (b1_p.size + b3_p.size) * 4
            + Bp * Vp * 4              # logits writeback
        ),
    )

    z_pad = pl.pallas_call(
        nplm_kernel,
        out_shape=jax.ShapeDtypeStruct((Bp, Vp), jnp.float32),
        grid=(nV, nB),
        in_specs=[
            pl.BlockSpec((tm, d_in), lambda v, b: (b, 0)),   # x: only re-DMA'd when b changes
            pl.BlockSpec((d_in, Hp), lambda v, b: (0, 0)),   # w1: fully resident
            pl.BlockSpec((1, Hp), lambda v, b: (0, 0)),      # b1
            pl.BlockSpec((Hp, tn), lambda v, b: (0, v)),     # w2 vocab tile (resident over inner b loop)
            pl.BlockSpec((d_in, tn), lambda v, b: (0, v)),   # w3 vocab tile
            pl.BlockSpec((1, tn), lambda v, b: (0, v)),      # b3 vocab tile
        ],
        out_specs=pl.BlockSpec((tm, tn), lambda v, b: (b, v)),
        scratch_shapes=[pltpu.VMEM((nB, tm, Hp), wdt)],       # cached hidden activations
        compiler_params=pltpu.CompilerParams(
            dimension_semantics=("arbitrary", "parallel"),
            vmem_limit_bytes=32 * 1024 * 1024,
        ),
        cost_estimate=cost,
    )(e_p, w1_p, b1_p, w2_p, w3_p, b3_p)

    # Strip batch / vocab padding before downstream softmax / loss.
    return z_pad[:B, :V]


def nplm_reference(tokens, emb_table, w1, b1, w2, w3, b3):
    """Pure-JAX f32 reference mirroring the PyTorch forward."""
    B = tokens.shape[0]
    e = jnp.take(emb_table, tokens, axis=0).reshape(B, -1).astype(jnp.float32)
    y = jnp.tanh(e @ w1 + b1)
    return e @ w3 + b3 + y @ w2


if __name__ == "__main__":
    # Small shapes consistent with the module's forward.
    vocab_size = 32
    n = 5            # context window => n-1 = 4 context tokens
    vec_dim = 8
    hidden_dim = 32
    batch = 8
    d_in = vec_dim * (n - 1)  # 32

    key = jax.random.PRNGKey(0)
    k_emb, k_w1, k_b1, k_w2, k_w3, k_b3, k_tok = jax.random.split(key, 7)

    # Deterministic synthetic parameters (shapes match the module's __init__,
    # weights stored [in_dim, out_dim] i.e. transposed vs PyTorch).
    emb_table = jax.random.normal(k_emb, (vocab_size, vec_dim), jnp.float32)
    w1 = jax.random.normal(k_w1, (d_in, hidden_dim), jnp.float32) * 0.1
    b1 = jax.random.normal(k_b1, (1, hidden_dim), jnp.float32) * 0.1
    w2 = jax.random.normal(k_w2, (hidden_dim, vocab_size), jnp.float32) * 0.1
    w3 = jax.random.normal(k_w3, (d_in, vocab_size), jnp.float32) * 0.1
    b3 = jax.random.normal(k_b3, (1, vocab_size), jnp.float32) * 0.1

    tokens = jax.random.randint(k_tok, (batch, n - 1), 0, vocab_size, jnp.int32)

    z = nplm_forward(tokens, emb_table, w1, b1, w2, w3, b3)
    z = jax.block_until_ready(z)

    z_ref = nplm_reference(tokens, emb_table, w1, b1, w2, w3, b3)
    assert z.shape == (batch, vocab_size)
    # bf16 weight/activation streaming with f32 accumulation -> modest tolerance
    # against the pure-f32 reference.
    assert jnp.allclose(z, z_ref, atol=5e-2, rtol=5e-2), float(
        jnp.max(jnp.abs(z - z_ref))
    )

    print("KERNEL_OK")
</pallas_src>

<mosaic_0001>
module attributes {stable_mosaic.version = 11 : i64} {
  func.func @nplm_kernel(%arg0: i32, %arg1: i32, %arg2: memref<128x32xbf16, #tpu.memory_space<vmem>>, %arg3: memref<32x128xbf16, #tpu.memory_space<vmem>>, %arg4: memref<1x128xf32, #tpu.memory_space<vmem>>, %arg5: memref<128x128xbf16, #tpu.memory_space<vmem>>, %arg6: memref<32x128xbf16, #tpu.memory_space<vmem>>, %arg7: memref<1x128xf32, #tpu.memory_space<vmem>>, %arg8: memref<128x128xf32, #tpu.memory_space<vmem>>, %arg9: memref<1x128x128xbf16, #tpu.memory_space<vmem>>) attributes {dimension_semantics = [#tpu.dimension_semantics<arbitrary>, #tpu.dimension_semantics<parallel>], iteration_bounds = array<i64: 1, 1>, scalar_prefetch = 0 : i64, scratch_operands = 1 : i64, tpu.core_type = #tpu.core_type<tc>, window_params = [{transform_indices = @transform_0, window_bounds = array<i64: 128, 32>}, {pipeline_mode = #tpu.pipeline_mode<synchronous>, transform_indices = @transform_1, window_bounds = array<i64: 32, 128>}, {pipeline_mode = #tpu.pipeline_mode<synchronous>, transform_indices = @transform_2, window_bounds = array<i64: 1, 128>}, {transform_indices = @transform_3, window_bounds = array<i64: 128, 128>}, {transform_indices = @transform_4, window_bounds = array<i64: 32, 128>}, {transform_indices = @transform_5, window_bounds = array<i64: 1, 128>}, {transform_indices = @transform_6, window_bounds = array<i64: 128, 128>}]} {
    %c0_i32 = arith.constant 0 : i32
    %0 = arith.cmpi eq, %arg0, %c0_i32 : i32
    %1 = arith.extui %0 : i1 to i32
    %c0_i32_0 = arith.constant 0 : i32
    %2 = arith.cmpi ne, %1, %c0_i32_0 : i32
    scf.if %2 {
      %c0_13 = arith.constant 0 : index
      %c0_14 = arith.constant 0 : index
      %16 = vector.load %arg2[%c0_13, %c0_14] : memref<128x32xbf16, #tpu.memory_space<vmem>>, vector<128x32xbf16>
      %c0_15 = arith.constant 0 : index
      %c0_16 = arith.constant 0 : index
      %17 = vector.load %arg3[%c0_15, %c0_16] : memref<32x128xbf16, #tpu.memory_space<vmem>>, vector<32x128xbf16>
      %cst_17 = arith.constant dense<0.000000e+00> : vector<128x128xf32>
      %18 = tpu.matmul %16, %17, %cst_17 {dimension_numbers = #tpu.dot_dimension_numbers<[1], [0], [0], [1], [0, 0, 1, 1], [], []>} : vector<128x32xbf16>, vector<32x128xbf16>, vector<128x128xf32> -> vector<128x128xf32>
      %c0_18 = arith.constant 0 : index
      %c0_19 = arith.constant 0 : index
      %19 = vector.load %arg4[%c0_18, %c0_19] : memref<1x128xf32, #tpu.memory_space<vmem>>, vector<1x128xf32>
      %20 = vector.broadcast %19 : vector<1x128xf32> to vector<128x128xf32>
      %21 = arith.addf %18, %20 : vector<128x128xf32>
      %22 = math.tanh %21 : vector<128x128xf32>
      %23 = arith.truncf %22 : vector<128x128xf32> to vector<128x128xbf16>
      %24 = arith.index_cast %arg1 : i32 to index
      %c0_20 = arith.constant 0 : index
      %c0_21 = arith.constant 0 : index
      %25 = vector.load %arg9[%24, %c0_20, %c0_21] : memref<1x128x128xbf16, #tpu.memory_space<vmem>>, vector<1x128x128xbf16>
      %26 = vector.shape_cast %25 : vector<1x128x128xbf16> to vector<128x128xbf16>
      %27 = vector.shape_cast %23 : vector<128x128xbf16> to vector<1x128x128xbf16>
      tpu.vector_store %arg9[%24, %c0_20, %c0_21], %27 {strides = array<i32>} : memref<1x128x128xbf16, #tpu.memory_space<vmem>>, vector<1x128x128xbf16>,
    } else {
    }
    %3 = arith.index_cast %arg1 : i32 to index
    %c0 = arith.constant 0 : index
    %c0_1 = arith.constant 0 : index
    %4 = vector.load %arg9[%3, %c0, %c0_1] : memref<1x128x128xbf16, #tpu.memory_space<vmem>>, vector<1x128x128xbf16>
    %5 = vector.shape_cast %4 : vector<1x128x128xbf16> to vector<128x128xbf16>
    %c0_2 = arith.constant 0 : index
    %c0_3 = arith.constant 0 : index
    %6 = vector.load %arg2[%c0_2, %c0_3] : memref<128x32xbf16, #tpu.memory_space<vmem>>, vector<128x32xbf16>
    %c0_4 = arith.constant 0 : index
    %c0_5 = arith.constant 0 : index
    %7 = vector.load %arg6[%c0_4, %c0_5] : memref<32x128xbf16, #tpu.memory_space<vmem>>, vector<32x128xbf16>
    %cst = arith.constant dense<0.000000e+00> : vector<128x128xf32>
    %8 = tpu.matmul %6, %7, %cst {dimension_numbers = #tpu.dot_dimension_numbers<[1], [0], [0], [1], [0, 0, 1, 1], [], []>} : vector<128x32xbf16>, vector<32x128xbf16>, vector<128x128xf32> -> vector<128x128xf32>
    %c0_6 = arith.constant 0 : index
    %c0_7 = arith.constant 0 : index
    %9 = vector.load %arg5[%c0_6, %c0_7] : memref<128x128xbf16, #tpu.memory_space<vmem>>, vector<128x128xbf16>
    %cst_8 = arith.constant dense<0.000000e+00> : vector<128x128xf32>
    %10 = tpu.matmul %5, %9, %cst_8 {dimension_numbers = #tpu.dot_dimension_numbers<[1], [0], [0], [1], [0, 0, 1, 1], [], []>} : vector<128x128xbf16>, vector<128x128xbf16>, vector<128x128xf32> -> vector<128x128xf32>
    %11 = arith.addf %8, %10 : vector<128x128xf32>
    %c0_9 = arith.constant 0 : index
    %c0_10 = arith.constant 0 : index
    %12 = vector.load %arg7[%c0_9, %c0_10] : memref<1x128xf32, #tpu.memory_space<vmem>>, vector<1x128xf32>
    %13 = vector.broadcast %12 : vector<1x128xf32> to vector<128x128xf32>
    %14 = arith.addf %11, %13 : vector<128x128xf32>
    %c0_11 = arith.constant 0 : index
    %c0_12 = arith.constant 0 : index
    %15 = vector.load %arg8[%c0_11, %c0_12] : memref<128x128xf32, #tpu.memory_space<vmem>>, vector<128x128xf32>
    tpu.vector_store %arg8[%c0_11, %c0_12], %14 {strides = array<i32>} : memref<128x128xf32, #tpu.memory_space<vmem>>, vector<128x128xf32>,
    return
  }
  func.func @transform_0(%arg0: i32, %arg1: i32) -> (i32, i32) {
    %c0_i32 = arith.constant 0 : i32
    %c0_i32_0 = arith.constant 0 : i32
    return %arg1, %c0_i32 : i32, i32
  }
  func.func @transform_1(%arg0: i32, %arg1: i32) -> (i32, i32) {
    %c0_i32 = arith.constant 0 : i32
    %c0_i32_0 = arith.constant 0 : i32
    %c0_i32_1 = arith.constant 0 : i32
    return %c0_i32, %c0_i32_0 : i32, i32
  }
  func.func @transform_2(%arg0: i32, %arg1: i32) -> (i32, i32) {
    %c0_i32 = arith.constant 0 : i32
    %c0_i32_0 = arith.constant 0 : i32
    %c0_i32_1 = arith.constant 0 : i32
    return %c0_i32, %c0_i32_0 : i32, i32
  }
  func.func @transform_3(%arg0: i32, %arg1: i32) -> (i32, i32) {
    %c0_i32 = arith.constant 0 : i32
    %c0_i32_0 = arith.constant 0 : i32
    return %c0_i32, %arg0 : i32, i32
  }
  func.func @transform_4(%arg0: i32, %arg1: i32) -> (i32, i32) {
    %c0_i32 = arith.constant 0 : i32
    %c0_i32_0 = arith.constant 0 : i32
    return %c0_i32, %arg0 : i32, i32
  }
  func.func @transform_5(%arg0: i32, %arg1: i32) -> (i32, i32) {
    %c0_i32 = arith.constant 0 : i32
    %c0_i32_0 = arith.constant 0 : i32
    return %c0_i32, %arg0 : i32, i32
  }
  func.func @transform_6(%arg0: i32, %arg1: i32) -> (i32, i32) {
    %c0_i32 = arith.constant 0 : i32
    return %arg1, %arg0 : i32, i32
  }
}

</mosaic_0001>

<bundles_post_ra>
// kernel: tpu_custom_call.1
= control target key start
LH: loop header
LB: loop body
LE: loop exit
PB: predicated region body
PF: predicated region fallthrough
CT: control target
= control target key end

     0   :  { %11 = vsyncpa [#allocation4], 0  ;;  %s1153_s0 = inlined_call_operand.vmem [shape: bf16[128,32], index: 0, kind: input, shape index: {}]   ;;  %s1154_s1 = inlined_call_operand.vmem [shape: bf16[32,128], index: 1, kind: input, shape index: {}]   ;;  %s1155_s2 = inlined_call_operand.vmem [shape: f32[1,128], index: 2, kind: input, shape index: {}]   ;;  %s1156_s3 = inlined_call_operand.vmem [shape: bf16[128,128], index: 3, kind: input, shape index: {}]   ;;  %s1157_s4 = inlined_call_operand.hbm [shape: bf16[32,128], index: 4, kind: input, shape index: {}]   ;;  %s1158_s5 = inlined_call_operand.vmem [shape: f32[1,128], index: 5, kind: input, shape index: {}]   ;;  %s1159_s6 = inlined_call_operand.hbm [shape: f32[128,128], index: 6, kind: output, shape index: {}]  }
   0x1   :  { %12 = vsyncpa [#allocation5], 0  ;;  %s25_s23 = sshll.u32 %s1157_s4, 4  ;;  %s970_s24 = smov [#allocation3]   ;;  %s26_s23 = int_to_ptr.hbm [resolvable:$true] %s25_s23 }
   0x2   :  { %s27_s25 = sshll.u32 %s970_s24, 4  ;;  %s971_s26 = smov 64   ;;  %s28_s25 = int_to_ptr.vmem [resolvable:$true] %s27_s25 }
   0x3   :  { %s972_s27 = smov 4  }
   0x4   :  { %33 = dma.hbm_to_vmem [thread:$0]  %s26_s23, 256, %s28_s25, [#allocation4], %s971_s26, %s971_s26, %s972_s27  }
   0x5   :  { %966 = dma.done.wait [#allocation4], 256  }
   0x6   :  { %967 = vsyncadd [#allocation4], 4294967040  ;;  %v796_v0 = vld [vmem:[%s1154_s1 + $0x8] sm:$0xff]  ;;  %v795_v1 = vld [vmem:[%s1154_s1] sm:$0xff]  ;;  %vm121_vm0 = vcmask 261120   ;;  %s614_s8 = sshll.u32 %s1159_s6, 4  ;;  %s615_s8 = int_to_ptr.hbm [resolvable:$true] %s614_s8 }
   0x7   :  { %152 = vmatpush.bf16.msra.mxu0 %v796_v0  ;;  %v787_v2 = vld [vmem:[%s1153_s0] sm:$0xff]  ;;  %v788_v3 = vld [vmem:[%s1153_s0 + $0x8] sm:$0xff]  ;;  %v789_v4 = vld [vmem:[%s1153_s0 + $0x10] sm:$0xff]  ;;  %s974_s4 = smov 128   ;;  %s975_s9 = smov 8  }
   0x8   :  { %v790_v5 = vld [vmem:[%s1153_s0 + $0x18] sm:$0xff]  ;;  %v791_v6 = vld [vmem:[%s1153_s0 + $0x20] sm:$0xff]  ;;  %v792_v7 = vld [vmem:[%s1153_s0 + $0x28] sm:$0xff] }
   0x9   :  { %v822_v8 = vld [vmem:[%s1156_s3 + $0x38] sm:$0xff]  ;;  %v793_v9 = vld [vmem:[%s1153_s0 + $0x30] sm:$0xff]  ;;  %v820_v11 = vld [vmem:[%s1156_s3 + $0x28] sm:$0xff] }
   0xa   :  { %397 = vmatpush.bf16.msra.mxu1 %v822_v8  ;;  %870 = vmatpush.bf16.msra.mxu3 %v822_v8  ;;  %v821_v10 = vld [vmem:[%s1156_s3 + $0x30] sm:$0xff]  ;;  %v819_v12 = vld [vmem:[%s1156_s3 + $0x20] sm:$0xff]  ;;  %v818_v13 = vld [vmem:[%s1156_s3 + $0x18] sm:$0xff] }
   0xb   :  { %153 = vmatpush.bf16.msra.mxu0 %v795_v1  ;;  %v814_v14 = vld [vmem:[#allocation3 + $0x8] sm:$0xff]  ;;  %v794_v15 = vld [vmem:[%s1153_s0 + $0x38] sm:$0xff]  ;;  %v817_v16 = vld [vmem:[%s1156_s3 + $0x10] sm:$0xff] }
   0xc   :  { %529 = vmatpush.bf16.msra.mxu2 %v814_v14  ;;  %v813_v17 = vld [vmem:[#allocation3] sm:$0xff]  ;;  %v816_v19 = vld [vmem:[%s1156_s3 + $0x8] sm:$0xff]  ;;  %v807_v31 = vld [vmem:[%s1153_s0 + $0x10] sm:$0xff] }
   0xd   :  { %v805_v18 = vld [vmem:[%s1153_s0] sm:$0xff]  ;;  %v806_v23 = vld [vmem:[%s1153_s0 + $0x8] sm:$0xff]  ;;  %v808_v40 = vld [vmem:[%s1153_s0 + $0x18] sm:$0xff] }
   0xe   :  { %667 = vmatmul.msk.bf16.vlgmr.msra.gmra.mxu0 %vm121_vm0, %v787_v2  ;;  %398 = vmatpush.bf16.msra.mxu1 %v821_v10  ;;  %v815_v20 = vld [vmem:[%s1156_s3] sm:$0xff]  ;;  %v810_v58 = vld [vmem:[%s1153_s0 + $0x28] sm:$0xff] }
   0xf   :  { %871 = vmatpush.bf16.msra.mxu3 %v821_v10  ;;  %v1083_v22 = vld [vmem:[%s1155_s2] ss:$0 sm:$0xff] }
  0x10   :  { %530 = vmatpush.bf16.msra.mxu2 %v813_v17  ;;  %v809_v49 = vld [vmem:[%s1153_s0 + $0x20] sm:$0xff] }
  0x12   :  { %399 = vmatpush.bf16.msra.mxu1 %v820_v11 }
  0x13   :  { %872 = vmatpush.bf16.msra.mxu3 %v820_v11  ;;  %779 = vmatmul.msk.bf16.vlgmr.msra.gmra.mxu2 %vm121_vm0, %v805_v18 }
  0x16   :  { %400 = vmatpush.bf16.msra.mxu1 %v819_v12 }
  0x17   :  { %873 = vmatpush.bf16.msra.mxu3 %v819_v12  ;;  %v812_v12 = vld [vmem:[%s1153_s0 + $0x38] sm:$0xff] }
  0x1a   :  { %401 = vmatpush.bf16.msra.mxu1 %v818_v13 }
  0x1b   :  { %874 = vmatpush.bf16.msra.mxu3 %v818_v13 }
  0x1e   :  { %668 = vmatmul.msk.bf16.gmra.mxu0 %vm121_vm0, %v788_v3  ;;  %402 = vmatpush.bf16.msra.mxu1 %v817_v16  ;;  %v811_v3 = vld [vmem:[%s1153_s0 + $0x30] sm:$0xff] }
  0x1f   :  { %875 = vmatpush.bf16.msra.mxu3 %v817_v16 }
  0x22   :  { %403 = vmatpush.bf16.msra.mxu1 %v816_v19 }
  0x23   :  { %876 = vmatpush.bf16.msra.mxu3 %v816_v19  ;;  %780 = vmatmul.msk.bf16.gmra.mxu2 %vm121_vm0, %v806_v23 }
  0x26   :  { %404 = vmatpush.bf16.msra.mxu1 %v815_v20 }
  0x27   :  { %877 = vmatpush.bf16.msra.mxu3 %v815_v20 }
  0x2e   :  { %669 = vmatmul.msk.bf16.gmra.mxu0 %vm121_vm0, %v789_v4 }
  0x33   :  { %781 = vmatmul.msk.bf16.gmra.mxu2 %vm121_vm0, %v807_v31 }
  0x3e   :  { %670 = vmatmul.msk.bf16.gmra.mxu0 %vm121_vm0, %v790_v5 }
  0x43   :  { %782 = vmatmul.msk.bf16.gmra.mxu2 %vm121_vm0, %v808_v40 }
  0x4e   :  { %671 = vmatmul.msk.bf16.gmra.mxu0 %vm121_vm0, %v791_v6 }
  0x53   :  { %783 = vmatmul.msk.bf16.gmra.mxu2 %vm121_vm0, %v809_v49 }
  0x5e   :  { %672 = vmatmul.msk.bf16.gmra.mxu0 %vm121_vm0, %v792_v7 }
  0x63   :  { %784 = vmatmul.msk.bf16.gmra.mxu2 %vm121_vm0, %v810_v58 }
  0x6e   :  { %673 = vmatmul.msk.bf16.gmra.mxu0 %vm121_vm0, %v793_v9 }
  0x73   :  { %785 = vmatmul.msk.bf16.gmra.mxu2 %vm121_vm0, %v811_v3 }
  0x7e   :  { %674 = vmatmul.msk.bf16.gmra.mxu0 %vm121_vm0, %v794_v15 }
  0x83   :  { %786 = vmatmul.msk.bf16.gmra.mxu2 %vm121_vm0, %v812_v12 }
  0x8b   :  { %v155_v21 = vpop.f32.mrf.mxu0 }
  0x8c   :  { %v156_v24 = vadd.f32 %v1083_v22, %v155_v21 }
  0x8e   :  { %886 = vtanh.f32 %v156_v24 }
  0x93   :  { %v157_v25 = vpop.f32.mrf.mxu0 }
  0x94   :  { %v158_v26 = vadd.f32 %v1083_v22, %v157_v25  ;;  %v887_v27 = vpop.eup %886 }
  0x96   :  { %888 = vtanh.f32 %v158_v26 }
  0x9b   :  { %v160_v28 = vpop.f32.mrf.mxu0 }
  0x9c   :  { %v889_v29 = vpop.eup %888  ;;  %v161_v32 = vadd.f32 %v1083_v22, %v160_v28 }
  0x9d   :  { %v826_v30 = vpack.c.bf16 %v889_v29, %v887_v27  ;;  %v532_v29 = vpop.f32.mrf.mxu2 }
  0x9e   :  { %890 = vtanh.f32 %v161_v32 }
  0x9f   :  { %827 = vst [vmem:[#allocation2 + $0x30] sm:$0xff] %v826_v30  }
  0xa3   :  { %v162_v33 = vpop.f32.mrf.mxu0 }
  0xa4   :  { %v163_v34 = vadd.f32 %v1083_v22, %v162_v33  ;;  %v891_v36 = vpop.eup %890  ;;  %v1132_v33 = vld [vmem:[%s1158_s5] ss:$0 sm:$0xff]  ;;  %s973_s5 = smov [#allocation6]  }
  0xa5   :  { %v534_v31 = vpop.f32.mrf.mxu2  ;;  %s612_s29 = sshll.u32 %s973_s5, 4  ;;  %s613_s29 = int_to_ptr.vmem [resolvable:$true] %s612_s29 }
  0xa6   :  { %892 = vtanh.f32 %v163_v34  ;;  %v797_v35 = vld [vmem:[#allocation2 + $0x30] sm:$0xff] }
  0xa7   :  { %405 = vmatmul.bf16.vlgmr.msra.gmra.mxu1 %v797_v35 }
  0xab   :  { %v165_v37 = vpop.f32.mrf.mxu0 }
  0xac   :  { %v893_v38 = vpop.eup %892  ;;  %v166_v41 = vadd.f32 %v1083_v22, %v165_v37 }
  0xad   :  { %v831_v39 = vpack.c.bf16 %v893_v38, %v891_v36  ;;  %v537_v32 = vpop.f32.mrf.mxu2 }
  0xae   :  { %894 = vtanh.f32 %v166_v41 }
  0xaf   :  { %863 = vst [vmem:[#allocation2] sm:$0xff] %v831_v39  }
  0xb3   :  { %v167_v42 = vpop.f32.mrf.mxu0 }
  0xb4   :  { %v168_v43 = vadd.f32 %v1083_v22, %v167_v42  ;;  %v895_v45 = vpop.eup %894 }
  0xb5   :  { %v539_v36 = vpop.f32.mrf.mxu2 }
  0xb6   :  { %896 = vtanh.f32 %v168_v43  ;;  %v798_v44 = vld [vmem:[#allocation2] sm:$0xff] }
  0xb7   :  { %410 = vmatmul.bf16.gmra.mxu1 %v798_v44 }
  0xbb   :  { %v170_v46 = vpop.f32.mrf.mxu0 }
  0xbc   :  { %v897_v47 = vpop.eup %896  ;;  %v171_v50 = vadd.f32 %v1083_v22, %v170_v46 }
  0xbd   :  { %v836_v48 = vpack.c.bf16 %v897_v47, %v895_v45  ;;  %v542_v41 = vpop.f32.mrf.mxu2 }
  0xbe   :  { %898 = vtanh.f32 %v171_v50 }
  0xbf   :  { %864 = vst [vmem:[#allocation2 + $0x18] sm:$0xff] %v836_v48  }
  0xc3   :  { %v172_v51 = vpop.f32.mrf.mxu0 }
  0xc4   :  { %v173_v52 = vadd.f32 %v1083_v22, %v172_v51  ;;  %v899_v54 = vpop.eup %898 }
  0xc5   :  { %v544_v46 = vpop.f32.mrf.mxu2 }
  0xc6   :  { %900 = vtanh.f32 %v173_v52  ;;  %v799_v53 = vld [vmem:[#allocation2 + $0x18] sm:$0xff] }
  0xc7   :  { %415 = vmatmul.bf16.gmra.mxu1 %v799_v53 }
  0xcb   :  { %v175_v55 = vpop.f32.mrf.mxu0 }
  0xcc   :  { %v901_v56 = vpop.eup %900  ;;  %v176_v59 = vadd.f32 %v1083_v22, %v175_v55 }
  0xcd   :  { %v841_v57 = vpack.c.bf16 %v901_v56, %v899_v54  ;;  %v547_v51 = vpop.f32.mrf.mxu2 }
  0xce   :  { %902 = vtanh.f32 %v176_v59 }
  0xcf   :  { %865 = vst [vmem:[#allocation2 + $0x10] sm:$0xff] %v841_v57  }
  0xd3   :  { %v177_v60 = vpop.f32.mrf.mxu0 }
  0xd4   :  { %v178_v61 = vadd.f32 %v1083_v22, %v177_v60  ;;  %v903_v63 = vpop.eup %902 }
  0xd5   :  { %v549_v55 = vpop.f32.mrf.mxu2 }
  0xd6   :  { %904 = vtanh.f32 %v178_v61  ;;  %v800_v62 = vld [vmem:[#allocation2 + $0x10] sm:$0xff] }
  0xd7   :  { %420 = vmatmul.bf16.gmra.mxu1 %v800_v62 }
  0xdb   :  { %v180_v0 = vpop.f32.mrf.mxu0 }
  0xdc   :  { %v905_v1 = vpop.eup %904  ;;  %v181_v4 = vadd.f32 %v1083_v22, %v180_v0 }
  0xdd   :  { %v846_v2 = vpack.c.bf16 %v905_v1, %v903_v63  ;;  %v552_v60 = vpop.f32.mrf.mxu2 }
  0xde   :  { %906 = vtanh.f32 %v181_v4 }
  0xdf   :  { %866 = vst [vmem:[#allocation2 + $0x8] sm:$0xff] %v846_v2  }
  0xe3   :  { %v182_v5 = vpop.f32.mrf.mxu0 }
  0xe4   :  { %v183_v6 = vadd.f32 %v1083_v22, %v182_v5  ;;  %v907_v8 = vpop.eup %906 }
  0xe5   :  { %v554_v1 = vpop.f32.mrf.mxu2 }
  0xe6   :  { %908 = vtanh.f32 %v183_v6  ;;  %v801_v7 = vld [vmem:[#allocation2 + $0x8] sm:$0xff] }
  0xe7   :  { %425 = vmatmul.bf16.gmra.mxu1 %v801_v7 }
  0xeb   :  { %v185_v9 = vpop.f32.mrf.mxu0 }
  0xec   :  { %v909_v10 = vpop.eup %908  ;;  %v186_v13 = vadd.f32 %v1083_v22, %v185_v9 }
  0xed   :  { %v851_v11 = vpack.c.bf16 %v909_v10, %v907_v8  ;;  %v557_v6 = vpop.f32.mrf.mxu2 }
  0xee   :  { %910 = vtanh.f32 %v186_v13 }
  0xef   :  { %867 = vst [vmem:[#allocation2 + $0x20] sm:$0xff] %v851_v11  }
  0xf3   :  { %v187_v14 = vpop.f32.mrf.mxu0 }
  0xf4   :  { %v188_v15 = vadd.f32 %v1083_v22, %v187_v14  ;;  %v911_v17 = vpop.eup %910 }
  0xf5   :  { %v559_v10 = vpop.f32.mrf.mxu2 }
  0xf6   :  { %912 = vtanh.f32 %v188_v15  ;;  %v802_v16 = vld [vmem:[#allocation2 + $0x20] sm:$0xff] }
  0xf7   :  { %430 = vmatmul.bf16.gmra.mxu1 %v802_v16 }
  0xfb   :  { %v190_v18 = vpop.f32.mrf.mxu0 }
  0xfc   :  { %v913_v19 = vpop.eup %912  ;;  %v191_v21 = vadd.f32 %v1083_v22, %v190_v18 }
  0xfd   :  { %v856_v20 = vpack.c.bf16 %v913_v19, %v911_v17  ;;  %v562_v14 = vpop.f32.mrf.mxu2 }
  0xfe   :  { %914 = vtanh.f32 %v191_v21 }
  0xff   :  { %868 = vst [vmem:[#allocation2 + $0x28] sm:$0xff] %v856_v20  }
 0x103   :  { %v192_v23 = vpop.f32.mrf.mxu0 }
 0x104   :  { %v193_v24 = vadd.f32 %v1083_v22, %v192_v23  ;;  %v915_v26 = vpop.eup %914 }
 0x105   :  { %v564_v18 = vpop.f32.mrf.mxu2 }
 0x106   :  { %916 = vtanh.f32 %v193_v24  ;;  %v803_v25 = vld [vmem:[#allocation2 + $0x28] sm:$0xff] }
 0x107   :  { %435 = vmatmul.bf16.vlgmr.msra.gmra.mxu3 %v803_v25 }
 0x10c   :  { %v917_v27 = vpop.eup %916 }
 0x10d   :  { %v861_v28 = vpack.c.bf16 %v917_v27, %v915_v26  ;;  %v567_v23 = vpop.f32.mrf.mxu2 }
 0x10f   :  { %869 = vst [vmem:[#allocation2 + $0x38] sm:$0xff] %v861_v28  }
 0x115   :  { %v569_v27 = vpop.f32.mrf.mxu2 }
 0x116   :  { %v804_v30 = vld [vmem:[#allocation2 + $0x38] sm:$0xff] }
 0x117   :  { %440 = vmatmul.bf16.gmra.mxu3 %v804_v30 }
 0x124   :  { %v406_v34 = vpop.f32.mrf.mxu1 }
 0x125   :  { %v533_v22 = vadd.f32 %v532_v29, %v406_v34 }
 0x127   :  { %v576_v35 = vadd.f32 %v1132_v33, %v533_v22 }
 0x129   :  { %592 = vst [vmem:[#allocation6] sm:$0xff] %v576_v35 }
 0x12c   :  { %v408_v37 = vpop.f32.mrf.mxu1 }
 0x12d   :  { %v535_v38 = vadd.f32 %v534_v31, %v408_v37 }
 0x12f   :  { %v577_v39 = vadd.f32 %v1132_v33, %v535_v38 }
 0x131   :  { %593 = vst [vmem:[#allocation6 + $0x8] sm:$0xff] %v577_v39 }
 0x134   :  { %v411_v40 = vpop.f32.mrf.mxu1 }
 0x135   :  { %v538_v42 = vadd.f32 %v537_v32, %v411_v40 }
 0x137   :  { %v578_v43 = vadd.f32 %v1132_v33, %v538_v42 }
 0x139   :  { %594 = vst [vmem:[#allocation6 + $0x10] sm:$0xff] %v578_v43 }
 0x13c   :  { %v413_v44 = vpop.f32.mrf.mxu1 }
 0x13d   :  { %v540_v45 = vadd.f32 %v539_v36, %v413_v44 }
 0x13f   :  { %v579_v47 = vadd.f32 %v1132_v33, %v540_v45 }
 0x141   :  { %595 = vst [vmem:[#allocation6 + $0x18] sm:$0xff] %v579_v47 }
 0x144   :  { %v416_v48 = vpop.f32.mrf.mxu1 }
 0x145   :  { %v543_v49 = vadd.f32 %v542_v41, %v416_v48 }
 0x147   :  { %v580_v50 = vadd.f32 %v1132_v33, %v543_v49 }
 0x149   :  { %596 = vst [vmem:[#allocation6 + $0x20] sm:$0xff] %v580_v50 }
 0x14c   :  { %v418_v52 = vpop.f32.mrf.mxu1 }
 0x14d   :  { %v545_v53 = vadd.f32 %v544_v46, %v418_v52 }
 0x14f   :  { %v581_v54 = vadd.f32 %v1132_v33, %v545_v53 }
 0x151   :  { %597 = vst [vmem:[#allocation6 + $0x28] sm:$0xff] %v581_v54 }
 0x154   :  { %v421_v56 = vpop.f32.mrf.mxu1 }
 0x155   :  { %v548_v57 = vadd.f32 %v547_v51, %v421_v56 }
 0x157   :  { %v582_v58 = vadd.f32 %v1132_v33, %v548_v57 }
 0x159   :  { %598 = vst [vmem:[#allocation6 + $0x30] sm:$0xff] %v582_v58 }
 0x15c   :  { %v423_v59 = vpop.f32.mrf.mxu1 }
 0x15d   :  { %v550_v61 = vadd.f32 %v549_v55, %v423_v59 }
 0x15f   :  { %v583_v62 = vadd.f32 %v1132_v33, %v550_v61 }
 0x161   :  { %599 = vst [vmem:[#allocation6 + $0x38] sm:$0xff] %v583_v62 }
 0x164   :  { %v426_v63 = vpop.f32.mrf.mxu1 }
 0x165   :  { %v553_v0 = vadd.f32 %v552_v60, %v426_v63 }
 0x167   :  { %v584_v2 = vadd.f32 %v1132_v33, %v553_v0 }
 0x169   :  { %600 = vst [vmem:[#allocation6 + $0x40] sm:$0xff] %v584_v2 }
 0x16c   :  { %v428_v3 = vpop.f32.mrf.mxu1 }
 0x16d   :  { %v555_v4 = vadd.f32 %v554_v1, %v428_v3 }
 0x16f   :  { %v585_v5 = vadd.f32 %v1132_v33, %v555_v4 }
 0x171   :  { %601 = vst [vmem:[#allocation6 + $0x48] sm:$0xff] %v585_v5 }
 0x174   :  { %v431_v7 = vpop.f32.mrf.mxu1 }
 0x175   :  { %v558_v8 = vadd.f32 %v557_v6, %v431_v7 }
 0x177   :  { %v586_v9 = vadd.f32 %v1132_v33, %v558_v8 }
 0x179   :  { %602 = vst [vmem:[#allocation6 + $0x50] sm:$0xff] %v586_v9 }
 0x17c   :  { %v433_v11 = vpop.f32.mrf.mxu1 }
 0x17d   :  { %v560_v12 = vadd.f32 %v559_v10, %v433_v11 }
 0x17f   :  { %v587_v13 = vadd.f32 %v1132_v33, %v560_v12 }
 0x181   :  { %603 = vst [vmem:[#allocation6 + $0x58] sm:$0xff] %v587_v13 }
 0x18a   :  { %v436_v15 = vpop.f32.mrf.mxu3 }
 0x18b   :  { %v563_v16 = vadd.f32 %v562_v14, %v436_v15 }
 0x18d   :  { %v588_v17 = vadd.f32 %v1132_v33, %v563_v16 }
 0x18f   :  { %604 = vst [vmem:[#allocation6 + $0x60] sm:$0xff] %v588_v17 }
 0x192   :  { %v438_v19 = vpop.f32.mrf.mxu3 }
 0x193   :  { %v565_v20 = vadd.f32 %v564_v18, %v438_v19 }
 0x195   :  { %v589_v21 = vadd.f32 %v1132_v33, %v565_v20 }
 0x197   :  { %605 = vst [vmem:[#allocation6 + $0x68] sm:$0xff] %v589_v21 }
 0x19a   :  { %v441_v24 = vpop.f32.mrf.mxu3 }
 0x19b   :  { %v568_v25 = vadd.f32 %v567_v23, %v441_v24 }
 0x19d   :  { %v590_v26 = vadd.f32 %v1132_v33, %v568_v25 }
 0x19f   :  { %606 = vst [vmem:[#allocation6 + $0x70] sm:$0xff] %v590_v26 }
 0x1a2   :  { %v443_v28 = vpop.f32.mrf.mxu3 }
 0x1a3   :  { %v570_v29 = vadd.f32 %v569_v27, %v443_v28 }
 0x1a5   :  { %v591_v30 = vadd.f32 %v1132_v33, %v570_v29 }
 0x1a7   :  { %607 = vst [vmem:[#allocation6 + $0x78] sm:$0xff] %v591_v30 }
 0x1a8   :  { %620 = dma.vmem_to_hbm [thread:$0]  %s613_s29, 2048, %s615_s8, [#allocation5], %s974_s4, %s974_s4, %s975_s9  }
 0x1a9   :  { %968 = dma.done.wait [#allocation5], 2048  }
 0x1aa   :  { %969 = vsyncadd [#allocation5], 4294965248 }
 0x1ab   :  { %625 = vsyncpa [#allocation4], 1 }
 0x1ac   :  { %626 = vsyncpa [#allocation5], 1 }

</bundles_post_ra>
